<compile_context>
chip_gen: v5e
topology: v5e:2x2
jax: 0.10.0
libtpu: 0.0.40
codegen_flags: <defaults>
</compile_context>

<pallas_src>
import functools

import jax
import jax.numpy as jnp
from jax.experimental import pallas as pl
from jax.experimental.pallas import tpu as pltpu

D_IN, D_H1, D_H2, D_OUT = 256, 128, 64, 32


def mlp_kernel(x_ref, w1_ref, b1_ref, w2_ref, b2_ref, w3_ref, b3_ref, o_ref):
    # In-kernel cast of the activations to the weight dtype (bf16 on the fast
    # path, no-op on the f32 path). Saves a full wrapper-side read+write pass
    # over x; the cast is VPU work hidden under the x-tile DMA.
    x = x_ref[...].astype(w1_ref.dtype)
    # fc1 + relu (MXU matmul, f32 accumulation)
    h1 = jnp.dot(x, w1_ref[...], preferred_element_type=jnp.float32)
    h1 = jnp.maximum(h1 + b1_ref[...], 0.0)
    # fc2 + relu
    h2 = jnp.dot(h1.astype(w2_ref.dtype), w2_ref[...],
                 preferred_element_type=jnp.float32)
    h2 = jnp.maximum(h2 + b2_ref[...], 0.0)
    # fc3 (real 32 output lanes; masked vst is fine, store slot is not the bottleneck)
    h3 = jnp.dot(h2.astype(w3_ref.dtype), w3_ref[...],
                 preferred_element_type=jnp.float32)
    o_ref[...] = (h3 + b3_ref[...]).astype(o_ref.dtype)


def prepare_params(params, compute_dtype=jnp.bfloat16):
    """One-time prep: cast weights to the MXU compute dtype; biases stay f32.

    Call once outside the hot path and reuse -> no per-forward cast/pad XLA ops.
    """
    w1, b1, w2, b2, w3, b3 = params
    return (w1.astype(compute_dtype), b1.astype(jnp.float32),
            w2.astype(compute_dtype), b2.astype(jnp.float32),
            w3.astype(compute_dtype), b3.astype(jnp.float32))


def _round_up(n, m):
    return ((n + m - 1) // m) * m


def _choose_tile(B, batch_tile):
    if B <= batch_tile:
        return B  # single block; full-array dims satisfy the (8,128) rule
    # Prefer >= 4 grid steps (>= 2 per TensorCore on dual-TC chips) while
    # keeping tiles >= 256 rows for DMA efficiency / per-step amortization.
    if B >= 4 * 256:
        return min(batch_tile, _round_up(pl.cdiv(B, 4), 8))
    return batch_tile


@functools.partial(jax.jit, static_argnames=("batch_tile",))
def aragi_forward(x, prepared_params, *, batch_tile=512):
    """x: (B, 256) float32. Returns (B, 32) float32."""
    w1, b1, w2, b2, w3, b3 = prepared_params
    B, F = x.shape
    assert F == D_IN

    tile = _choose_tile(B, batch_tile)
    # Ragged last tile is fine: rows are independent, OOB input rows produce
    # garbage only in OOB output rows, whose writes Pallas masks.
    n_tiles = pl.cdiv(B, tile)

    mm_elems = D_IN * D_H1 + D_H1 * D_H2 + D_H2 * D_OUT
    flops = 2 * B * mm_elems
    bytes_accessed = (
        B * D_IN * x.dtype.itemsize          # x in (cast to bf16 in-kernel)
        + B * D_OUT * 4                      # out (f32, 32 real lanes only)
        + mm_elems * w1.dtype.itemsize       # weights (constant index_map -> fetched once)
        + (D_H1 + D_H2 + D_OUT) * 4          # biases (f32)
    )

    return pl.pallas_call(
        mlp_kernel,
        out_shape=jax.ShapeDtypeStruct((B, D_OUT), jnp.float32),
        grid_spec=pltpu.PrefetchScalarGridSpec(
            num_scalar_prefetch=0,
            grid=(n_tiles,),
            in_specs=[
                pl.BlockSpec((tile, D_IN), lambda i: (i, 0)),   # x tile
                pl.BlockSpec((D_IN, D_H1), lambda i: (0, 0)),   # w1
                pl.BlockSpec((1, D_H1), lambda i: (0, 0)),      # b1
                pl.BlockSpec((D_H1, D_H2), lambda i: (0, 0)),   # w2
                pl.BlockSpec((1, D_H2), lambda i: (0, 0)),      # b2
                pl.BlockSpec((D_H2, D_OUT), lambda i: (0, 0)),  # w3
                pl.BlockSpec((1, D_OUT), lambda i: (0, 0)),     # b3
            ],
            out_specs=pl.BlockSpec((tile, D_OUT), lambda i: (i, 0)),
        ),
        compiler_params=pltpu.CompilerParams(
            dimension_semantics=("parallel",),
        ),
        cost_estimate=pl.CostEstimate(
            flops=flops, transcendentals=0, bytes_accessed=bytes_accessed),
    )(x, w1, b1, w2, b2, w3, b3)


def init_params(key):
    """Deterministic init mimicking nn.Linear defaults: U(-1/sqrt(fan_in), 1/sqrt(fan_in)).

    Weights stored as (in_features, out_features) == PyTorch weight.T, so each
    layer is y = x @ W + b (matches nn.Linear semantics).
    """
    dims = [(D_IN, D_H1), (D_H1, D_H2), (D_H2, D_OUT)]
    params = []
    for i, (fan_in, fan_out) in enumerate(dims):
        kw, kb = jax.random.split(jax.random.fold_in(key, i))
        bound = 1.0 / (fan_in ** 0.5)
        w = jax.random.uniform(kw, (fan_in, fan_out), jnp.float32, -bound, bound)
        b = jax.random.uniform(kb, (1, fan_out), jnp.float32, -bound, bound)
        params += [w, b]
    return tuple(params)


def reference_forward(x, params):
    w1, b1, w2, b2, w3, b3 = params
    h = jnp.maximum(x @ w1 + b1, 0.0)
    h = jnp.maximum(h @ w2 + b2, 0.0)
    return h @ w3 + b3


if __name__ == "__main__":
    key = jax.random.PRNGKey(0)
    kx, kp = jax.random.split(key)
    params = init_params(kp)

    # 1) Exact-semantics check: f32 operands, small non-multiple-of-8 batch
    #    (single full-array block).
    B_small = 300
    x_small = jax.random.normal(jax.random.fold_in(kx, 0), (B_small, D_IN), jnp.float32)
    p_f32 = prepare_params(params, compute_dtype=jnp.float32)
    out_f32 = jax.block_until_ready(aragi_forward(x_small, p_f32))
    ref_small = reference_forward(x_small, params)
    assert out_f32.shape == (B_small, D_OUT)
    assert jnp.allclose(out_f32, ref_small, atol=1e-4, rtol=1e-4)

    # 2) Fast path: bf16 operands on the MXU, f32 accumulation, multi-tile
    #    grid with a ragged last tile (exercises masked OOB writes).
    B = 1000
    x = jax.random.normal(jax.random.fold_in(kx, 1), (B, D_IN), jnp.float32)
    p_bf16 = prepare_params(params, compute_dtype=jnp.bfloat16)
    out = jax.block_until_ready(aragi_forward(x, p_bf16, batch_tile=512))
    ref = reference_forward(x, params)
    assert out.shape == (B, D_OUT)
    assert jnp.allclose(out, ref, atol=5e-2, rtol=5e-2)

    print("KERNEL_OK")
</pallas_src>

<mosaic_0001>
module attributes {stable_mosaic.version = 11 : i64} {
  func.func @mlp_kernel(%arg0: i32, %arg1: memref<300x256xf32, #tpu.memory_space<vmem>>, %arg2: memref<256x128xf32, #tpu.memory_space<vmem>>, %arg3: memref<1x128xf32, #tpu.memory_space<vmem>>, %arg4: memref<128x64xf32, #tpu.memory_space<vmem>>, %arg5: memref<1x64xf32, #tpu.memory_space<vmem>>, %arg6: memref<64x32xf32, #tpu.memory_space<vmem>>, %arg7: memref<1x32xf32, #tpu.memory_space<vmem>>, %arg8: memref<300x32xf32, #tpu.memory_space<vmem>>) attributes {dimension_semantics = [#tpu.dimension_semantics<parallel>], iteration_bounds = array<i64: 1>, scalar_prefetch = 0 : i64, scratch_operands = 0 : i64, tpu.core_type = #tpu.core_type<tc>, window_params = [{transform_indices = @transform_0, window_bounds = array<i64: 300, 256>}, {pipeline_mode = #tpu.pipeline_mode<synchronous>, transform_indices = @transform_1, window_bounds = array<i64: 256, 128>}, {pipeline_mode = #tpu.pipeline_mode<synchronous>, transform_indices = @transform_2, window_bounds = array<i64: 1, 128>}, {pipeline_mode = #tpu.pipeline_mode<synchronous>, transform_indices = @transform_3, window_bounds = array<i64: 128, 64>}, {pipeline_mode = #tpu.pipeline_mode<synchronous>, transform_indices = @transform_4, window_bounds = array<i64: 1, 64>}, {pipeline_mode = #tpu.pipeline_mode<synchronous>, transform_indices = @transform_5, window_bounds = array<i64: 64, 32>}, {pipeline_mode = #tpu.pipeline_mode<synchronous>, transform_indices = @transform_6, window_bounds = array<i64: 1, 32>}, {transform_indices = @transform_7, window_bounds = array<i64: 300, 32>}]} {
    %c0 = arith.constant 0 : index
    %c0_0 = arith.constant 0 : index
    %0 = vector.load %arg1[%c0, %c0_0] : memref<300x256xf32, #tpu.memory_space<vmem>>, vector<300x256xf32>
    %c0_1 = arith.constant 0 : index
    %c0_2 = arith.constant 0 : index
    %1 = vector.load %arg2[%c0_1, %c0_2] : memref<256x128xf32, #tpu.memory_space<vmem>>, vector<256x128xf32>
    %cst = arith.constant dense<0.000000e+00> : vector<300x128xf32>
    %2 = tpu.matmul %0, %1, %cst {dimension_numbers = #tpu.dot_dimension_numbers<[1], [0], [0], [1], [0, 0, 1, 1], [], []>} : vector<300x256xf32>, vector<256x128xf32>, vector<300x128xf32> -> vector<300x128xf32>
    %c0_3 = arith.constant 0 : index
    %c0_4 = arith.constant 0 : index
    %3 = vector.load %arg3[%c0_3, %c0_4] : memref<1x128xf32, #tpu.memory_space<vmem>>, vector<1x128xf32>
    %4 = vector.broadcast %3 : vector<1x128xf32> to vector<300x128xf32>
    %5 = arith.addf %2, %4 : vector<300x128xf32>
    %cst_5 = arith.constant 0.000000e+00 : f32
    %6 = vector.broadcast %cst_5 : f32 to vector<300x128xf32>
    %7 = arith.maximumf %5, %6 : vector<300x128xf32>
    %c0_6 = arith.constant 0 : index
    %c0_7 = arith.constant 0 : index
    %8 = vector.load %arg4[%c0_6, %c0_7] : memref<128x64xf32, #tpu.memory_space<vmem>>, vector<128x64xf32>
    %cst_8 = arith.constant dense<0.000000e+00> : vector<300x64xf32>
    %9 = tpu.matmul %7, %8, %cst_8 {dimension_numbers = #tpu.dot_dimension_numbers<[1], [0], [0], [1], [0, 0, 1, 1], [], []>} : vector<300x128xf32>, vector<128x64xf32>, vector<300x64xf32> -> vector<300x64xf32>
    %c0_9 = arith.constant 0 : index
    %c0_10 = arith.constant 0 : index
    %10 = vector.load %arg5[%c0_9, %c0_10] : memref<1x64xf32, #tpu.memory_space<vmem>>, vector<1x64xf32>
    %11 = vector.broadcast %10 : vector<1x64xf32> to vector<300x64xf32>
    %12 = arith.addf %9, %11 : vector<300x64xf32>
    %cst_11 = arith.constant 0.000000e+00 : f32
    %13 = vector.broadcast %cst_11 : f32 to vector<300x64xf32>
    %14 = arith.maximumf %12, %13 : vector<300x64xf32>
    %c0_12 = arith.constant 0 : index
    %c0_13 = arith.constant 0 : index
    %15 = vector.load %arg6[%c0_12, %c0_13] : memref<64x32xf32, #tpu.memory_space<vmem>>, vector<64x32xf32>
    %cst_14 = arith.constant dense<0.000000e+00> : vector<300x32xf32>
    %16 = tpu.matmul %14, %15, %cst_14 {dimension_numbers = #tpu.dot_dimension_numbers<[1], [0], [0], [1], [0, 0, 1, 1], [], []>} : vector<300x64xf32>, vector<64x32xf32>, vector<300x32xf32> -> vector<300x32xf32>
    %c0_15 = arith.constant 0 : index
    %c0_16 = arith.constant 0 : index
    %17 = vector.load %arg7[%c0_15, %c0_16] : memref<1x32xf32, #tpu.memory_space<vmem>>, vector<1x32xf32>
    %18 = vector.broadcast %17 : vector<1x32xf32> to vector<300x32xf32>
    %19 = arith.addf %16, %18 : vector<300x32xf32>
    %c0_17 = arith.constant 0 : index
    %c0_18 = arith.constant 0 : index
    %20 = vector.load %arg8[%c0_17, %c0_18] : memref<300x32xf32, #tpu.memory_space<vmem>>, vector<300x32xf32>
    tpu.vector_store %arg8[%c0_17, %c0_18], %19 {strides = array<i32>} : memref<300x32xf32, #tpu.memory_space<vmem>>, vector<300x32xf32>,
    return
  }
  func.func @transform_0(%arg0: i32) -> (i32, i32) {
    %c0_i32 = arith.constant 0 : i32
    %c0_i32_0 = arith.constant 0 : i32
    return %arg0, %c0_i32 : i32, i32
  }
  func.func @transform_1(%arg0: i32) -> (i32, i32) {
    %c0_i32 = arith.constant 0 : i32
    %c0_i32_0 = arith.constant 0 : i32
    %c0_i32_1 = arith.constant 0 : i32
    return %c0_i32, %c0_i32_0 : i32, i32
  }
  func.func @transform_2(%arg0: i32) -> (i32, i32) {
    %c0_i32 = arith.constant 0 : i32
    %c0_i32_0 = arith.constant 0 : i32
    %c0_i32_1 = arith.constant 0 : i32
    return %c0_i32, %c0_i32_0 : i32, i32
  }
  func.func @transform_3(%arg0: i32) -> (i32, i32) {
    %c0_i32 = arith.constant 0 : i32
    %c0_i32_0 = arith.constant 0 : i32
    %c0_i32_1 = arith.constant 0 : i32
    return %c0_i32, %c0_i32_0 : i32, i32
  }
  func.func @transform_4(%arg0: i32) -> (i32, i32) {
    %c0_i32 = arith.constant 0 : i32
    %c0_i32_0 = arith.constant 0 : i32
    %c0_i32_1 = arith.constant 0 : i32
    return %c0_i32, %c0_i32_0 : i32, i32
  }
  func.func @transform_5(%arg0: i32) -> (i32, i32) {
    %c0_i32 = arith.constant 0 : i32
    %c0_i32_0 = arith.constant 0 : i32
    %c0_i32_1 = arith.constant 0 : i32
    return %c0_i32, %c0_i32_0 : i32, i32
  }
  func.func @transform_6(%arg0: i32) -> (i32, i32) {
    %c0_i32 = arith.constant 0 : i32
    %c0_i32_0 = arith.constant 0 : i32
    %c0_i32_1 = arith.constant 0 : i32
    return %c0_i32, %c0_i32_0 : i32, i32
  }
  func.func @transform_7(%arg0: i32) -> (i32, i32) {
    %c0_i32 = arith.constant 0 : i32
    %c0_i32_0 = arith.constant 0 : i32
    return %arg0, %c0_i32 : i32, i32
  }
}

</mosaic_0001>

<bundles_post_ra>
// kernel: aragi_forward.1
= control target key start
LH: loop header
LB: loop body
LE: loop exit
PB: predicated region body
PF: predicated region fallthrough
CT: control target
= control target key end

     0   :  { %12 = vsyncpa [#allocation3], 0  ;;  %s1016_s27 = smov [#allocation2]   ;;  %s1017_s29 = smov 256   ;;  %s1548_s0 = inlined_call_operand.hbm [shape: f32[300,256], index: 0, kind: input, shape index: {}]   ;;  %s1549_s1 = inlined_call_operand.vmem [shape: f32[256,128], index: 1, kind: input, shape index: {}]   ;;  %s1550_s2 = inlined_call_operand.vmem [shape: f32[1,128], index: 2, kind: input, shape index: {}]   ;;  %s1551_s3 = inlined_call_operand.vmem [shape: f32[128,64], index: 3, kind: input, shape index: {}]   ;;  %s1552_s4 = inlined_call_operand.vmem [shape: f32[1,64], index: 4, kind: input, shape index: {}]   ;;  %s1553_s5 = inlined_call_operand.vmem [shape: f32[64,32], index: 5, kind: input, shape index: {}]   ;;  %s1554_s6 = inlined_call_operand.vmem [shape: f32[1,32], index: 6, kind: input, shape index: {}]   ;;  %s1555_s7 = inlined_call_operand.vmem [shape: f32[300,32], index: 7, kind: output, shape index: {}]  }
   0x1   :  { %s17_s26 = sshll.u32 %s1548_s0, 4  ;;  %s19_s28 = sshll.u32 %s1016_s27, 4  ;;  %s18_s26 = int_to_ptr.hbm [resolvable:$true] %s17_s26  ;;  %s20_s28 = int_to_ptr.vmem [resolvable:$true] %s19_s28 }
   0x2   :  { %s1018_s30 = smov 16  }
   0x3   :  { %25 = dma.hbm_to_vmem [thread:$0]  %s18_s26, 9728, %s20_s28, [#allocation3], %s1017_s29, %s1017_s29, %s1018_s30  }
   0x4   :  { %1014 = dma.done.wait [#allocation3], 9728  }
   0x5   :  { %1015 = vsyncadd [#allocation3], 4294957568  ;;  %v133_v0 = vld [vmem:[%s1549_s1 + $0x78] sm:$0xff]  ;;  %v132_v1 = vld [vmem:[%s1549_s1 + $0x70] sm:$0xff]  ;;  %vm655_vm0 = vcmask 523264   ;;  %vm901_vm1 = vcmask 261120  }
   0x6   :  { %v149_v2 = vld [vmem:[%s1549_s1 + $0xf8] sm:$0xff]  ;;  %154 = vmatpush.msra.mxu0 %v133_v0  ;;  %v148_v3 = vld [vmem:[%s1549_s1 + $0xf0] sm:$0xff]  ;;  %v131_v4 = vld [vmem:[%s1549_s1 + $0x68] sm:$0xff]  ;;  %vm939_vm2 = vcmask 257024  }
   0x7   :  { %285 = vmatpush.msra.mxu1 %v149_v2  ;;  %v147_v5 = vld [vmem:[%s1549_s1 + $0xe8] sm:$0xff]  ;;  %v130_v6 = vld [vmem:[%s1549_s1 + $0x60] sm:$0xff]  ;;  %v129_v8 = vld [vmem:[%s1549_s1 + $0x58] sm:$0xff] }
   0x8   :  { %155 = vmatpush.msra.mxu0 %v132_v1  ;;  %v146_v7 = vld [vmem:[%s1549_s1 + $0xe0] sm:$0xff]  ;;  %v145_v9 = vld [vmem:[%s1549_s1 + $0xd8] sm:$0xff]  ;;  %v128_v10 = vld [vmem:[%s1549_s1 + $0x50] sm:$0xff] }
   0x9   :  { %286 = vmatpush.msra.mxu1 %v148_v3  ;;  %v144_v11 = vld [vmem:[%s1549_s1 + $0xd0] sm:$0xff]  ;;  %v127_v12 = vld [vmem:[%s1549_s1 + $0x48] sm:$0xff]  ;;  %v126_v14 = vld [vmem:[%s1549_s1 + $0x40] sm:$0xff] }
   0xa   :  { %156 = vmatpush.msra.mxu0 %v131_v4  ;;  %v143_v13 = vld [vmem:[%s1549_s1 + $0xc8] sm:$0xff]  ;;  %v142_v15 = vld [vmem:[%s1549_s1 + $0xc0] sm:$0xff]  ;;  %v125_v16 = vld [vmem:[%s1549_s1 + $0x38] sm:$0xff] }
   0xb   :  { %287 = vmatpush.msra.mxu1 %v147_v5  ;;  %v141_v17 = vld [vmem:[%s1549_s1 + $0xb8] sm:$0xff]  ;;  %v124_v18 = vld [vmem:[%s1549_s1 + $0x30] sm:$0xff]  ;;  %v123_v20 = vld [vmem:[%s1549_s1 + $0x28] sm:$0xff] }
   0xc   :  { %157 = vmatpush.msra.mxu0 %v130_v6  ;;  %v140_v19 = vld [vmem:[%s1549_s1 + $0xb0] sm:$0xff]  ;;  %v139_v21 = vld [vmem:[%s1549_s1 + $0xa8] sm:$0xff]  ;;  %v122_v22 = vld [vmem:[%s1549_s1 + $0x20] sm:$0xff] }
   0xd   :  { %288 = vmatpush.msra.mxu1 %v146_v7  ;;  %v138_v23 = vld [vmem:[%s1549_s1 + $0xa0] sm:$0xff]  ;;  %v121_v24 = vld [vmem:[%s1549_s1 + $0x18] sm:$0xff]  ;;  %v120_v26 = vld [vmem:[%s1549_s1 + $0x10] sm:$0xff] }
   0xe   :  { %158 = vmatpush.msra.mxu0 %v129_v8  ;;  %v137_v25 = vld [vmem:[%s1549_s1 + $0x98] sm:$0xff]  ;;  %v136_v27 = vld [vmem:[%s1549_s1 + $0x90] sm:$0xff]  ;;  %v119_v28 = vld [vmem:[%s1549_s1 + $0x8] sm:$0xff] }
   0xf   :  { %289 = vmatpush.msra.mxu1 %v145_v9  ;;  %v135_v29 = vld [vmem:[%s1549_s1 + $0x88] sm:$0xff]  ;;  %v118_v30 = vld [vmem:[%s1549_s1] sm:$0xff]  ;;  %v44_v34 = vld [vmem:[#allocation2 + $0x10] sm:$0xff] }
  0x10   :  { %159 = vmatpush.msra.mxu0 %v128_v10  ;;  %v134_v31 = vld [vmem:[%s1549_s1 + $0x80] sm:$0xff]  ;;  %v43_v33 = vld [vmem:[#allocation2 + $0x8] sm:$0xff]  ;;  %v45_v35 = vld [vmem:[#allocation2 + $0x18] sm:$0xff] }
  0x11   :  { %290 = vmatpush.msra.mxu1 %v144_v11  ;;  %v42_v32 = vld [vmem:[#allocation2] sm:$0xff]  ;;  %v47_v37 = vld [vmem:[#allocation2 + $0x28] sm:$0xff]  ;;  %v48_v38 = vld [vmem:[#allocation2 + $0x30] sm:$0xff] }
  0x12   :  { %160 = vmatpush.msra.mxu0 %v127_v12  ;;  %v46_v36 = vld [vmem:[#allocation2 + $0x20] sm:$0xff]  ;;  %v49_v39 = vld [vmem:[#allocation2 + $0x38] sm:$0xff]  ;;  %v51_v41 = vld [vmem:[#allocation2 + $0x48] sm:$0xff] }
  0x13   :  { %291 = vmatpush.msra.mxu1 %v143_v13  ;;  %v50_v40 = vld [vmem:[#allocation2 + $0x40] sm:$0xff]  ;;  %v52_v42 = vld [vmem:[#allocation2 + $0x50] sm:$0xff]  ;;  %v53_v43 = vld [vmem:[#allocation2 + $0x58] sm:$0xff] }
  0x14   :  { %161 = vmatpush.msra.mxu0 %v126_v14  ;;  %v54_v44 = vld [vmem:[#allocation2 + $0x60] sm:$0xff]  ;;  %v55_v45 = vld [vmem:[#allocation2 + $0x68] sm:$0xff]  ;;  %v56_v46 = vld [vmem:[#allocation2 + $0x70] sm:$0xff] }
  0x15   :  { %292 = vmatpush.msra.mxu1 %v142_v15  ;;  %v57_v47 = vld [vmem:[#allocation2 + $0x78] sm:$0xff]  ;;  %v58_v48 = vld [vmem:[#allocation2 + $0x80] sm:$0xff]  ;;  %v59_v49 = vld [vmem:[#allocation2 + $0x88] sm:$0xff] }
  0x16   :  { %162 = vmatpush.msra.mxu0 %v125_v16  ;;  %v469_v50 = vld [vmem:[%s1551_s3 + $0x78] sm:$0xff]  ;;  %v468_v51 = vld [vmem:[%s1551_s3 + $0x70] sm:$0xff]  ;;  %v467_v54 = vld [vmem:[%s1551_s3 + $0x68] sm:$0xff] }
  0x17   :  { %293 = vmatpush.msra.mxu1 %v141_v17  ;;  %474 = vmatpush.msra.mxu2 %v469_v50  ;;  %v60_v52 = vld [vmem:[#allocation2 + $0x90] sm:$0xff]  ;;  %v61_v53 = vld [vmem:[#allocation2 + $0x98] sm:$0xff]  ;;  %v466_v55 = vld [vmem:[%s1551_s3 + $0x60] sm:$0xff] }
  0x18   :  { %163 = vmatpush.msra.mxu0 %v124_v18  ;;  %v465_v56 = vld [vmem:[%s1551_s3 + $0x58] sm:$0xff]  ;;  %v464_v57 = vld [vmem:[%s1551_s3 + $0x50] sm:$0xff]  ;;  %v62_v58 = vld [vmem:[#allocation2 + $0xa0] sm:$0xff] }
  0x19   :  { %294 = vmatpush.msra.mxu1 %v140_v19  ;;  %475 = vmatpush.msra.mxu2 %v468_v51  ;;  %v63_v59 = vld [vmem:[#allocation2 + $0xa8] sm:$0xff]  ;;  %v462_v61 = vld [vmem:[%s1551_s3 + $0x40] sm:$0xff]  ;;  %v461_v62 = vld [vmem:[%s1551_s3 + $0x38] sm:$0xff] }
  0x1a   :  { %164 = vmatpush.msra.mxu0 %v123_v20  ;;  %v463_v60 = vld [vmem:[%s1551_s3 + $0x48] sm:$0xff]  ;;  %v460_v63 = vld [vmem:[%s1551_s3 + $0x30] sm:$0xff]  ;;  %v65_v1 = vld [vmem:[#allocation2 + $0xb8] sm:$0xff] }
  0x1b   :  { %295 = vmatpush.msra.mxu1 %v139_v21  ;;  %476 = vmatpush.msra.mxu2 %v467_v54  ;;  %v64_v0 = vld [vmem:[#allocation2 + $0xb0] sm:$0xff]  ;;  %v459_v2 = vld [vmem:[%s1551_s3 + $0x28] sm:$0xff]  ;;  %v458_v3 = vld [vmem:[%s1551_s3 + $0x20] sm:$0xff] }
  0x1c   :  { %165 = vmatpush.msra.mxu0 %v122_v22  ;;  %v457_v4 = vld [vmem:[%s1551_s3 + $0x18] sm:$0xff]  ;;  %v66_v5 = vld [vmem:[#allocation2 + $0xc0] sm:$0xff]  ;;  %v67_v6 = vld [vmem:[#allocation2 + $0xc8] sm:$0xff] }
  0x1d   :  { %296 = vmatpush.msra.mxu1 %v138_v23  ;;  %477 = vmatpush.msra.mxu2 %v466_v55  ;;  %v456_v7 = vld [vmem:[%s1551_s3 + $0x10] sm:$0xff]  ;;  %v455_v8 = vld [vmem:[%s1551_s3 + $0x8] sm:$0xff]  ;;  %v454_v9 = vld [vmem:[%s1551_s3] sm:$0xff] }
  0x1e   :  { %166 = vmatpush.msra.mxu0 %v121_v24  ;;  %v68_v10 = vld [vmem:[#allocation2 + $0xd0] sm:$0xff]  ;;  %v69_v11 = vld [vmem:[#allocation2 + $0xd8] sm:$0xff]  ;;  %v70_v12 = vld [vmem:[#allocation2 + $0xe0] sm:$0xff] }
  0x1f   :  { %297 = vmatpush.msra.mxu1 %v137_v25  ;;  %478 = vmatpush.msra.mxu2 %v465_v56  ;;  %v71_v13 = vld [vmem:[#allocation2 + $0xe8] sm:$0xff]  ;;  %v72_v14 = vld [vmem:[#allocation2 + $0xf0] sm:$0xff]  ;;  %v73_v15 = vld [vmem:[#allocation2 + $0xf8] sm:$0xff] }
  0x20   :  { %167 = vmatpush.msra.mxu0 %v120_v26  ;;  %v1209_v16 = vld [vmem:[%s1550_s2] ss:$0 sm:$0xff]  ;;  %v75_v20 = vld [vmem:[#allocation2 + $0x108] sm:$0xff]  ;;  %v76_v26 = vld [vmem:[#allocation2 + $0x110] sm:$0xff] }
  0x21   :  { %298 = vmatpush.msra.mxu1 %v136_v27  ;;  %479 = vmatpush.msra.mxu2 %v464_v57  ;;  %v74_v19 = vld [vmem:[#allocation2 + $0x100] sm:$0xff]  ;;  %v77_v27 = vld [vmem:[#allocation2 + $0x118] sm:$0xff]  ;;  %v84_v54 = vld [vmem:[#allocation2 + $0x150] sm:$0xff] }
  0x22   :  { %168 = vmatpush.msra.mxu0 %v119_v28  ;;  %v85_v55 = vld [vmem:[#allocation2 + $0x158] sm:$0xff] }
  0x23   :  { %299 = vmatpush.msra.mxu1 %v135_v29  ;;  %480 = vmatpush.msra.mxu2 %v463_v60 }
  0x24   :  { %169 = vmatpush.msra.mxu0 %v118_v30 }
  0x25   :  { %300 = vmatpush.msra.mxu1 %v134_v31  ;;  %170 = vmatmul.f32.vlgmr.msra.gmra.mxu0 %v42_v32 }
  0x26   :  { %301 = vmatmul.f32.vlgmr.msra.gmra.mxu1 %v43_v33  ;;  %481 = vmatpush.msra.mxu2 %v462_v61  ;;  %v78_v33 = vld [vmem:[#allocation2 + $0x120] sm:$0xff] }
  0x27   :  { %v86_v61 = vld [vmem:[#allocation2 + $0x160] sm:$0xff] }
  0x28   :  { %482 = vmatpush.msra.mxu2 %v461_v62  ;;  %v87_v62 = vld [vmem:[#allocation2 + $0x168] sm:$0xff] }
  0x2a   :  { %483 = vmatpush.msra.mxu2 %v460_v63 }
  0x2c   :  { %484 = vmatpush.msra.mxu2 %v459_v2 }
  0x2d   :  { %173 = vmatmul.f32.gmra.mxu0 %v44_v34  ;;  %v79_v34 = vld [vmem:[#allocation2 + $0x128] sm:$0xff] }
  0x2e   :  { %304 = vmatmul.f32.gmra.mxu1 %v45_v35  ;;  %485 = vmatpush.msra.mxu2 %v458_v3 }
  0x30   :  { %486 = vmatpush.msra.mxu2 %v457_v4  ;;  %v88_v4 = vld [vmem:[#allocation2 + $0x170] sm:$0xff] }
  0x32   :  { %487 = vmatpush.msra.mxu2 %v456_v7 }
  0x34   :  { %488 = vmatpush.msra.mxu2 %v455_v8 }
  0x35   :  { %176 = vmatmul.f32.gmra.mxu0 %v46_v36 }
  0x36   :  { %307 = vmatmul.f32.gmra.mxu1 %v47_v37  ;;  %489 = vmatpush.msra.mxu2 %v454_v9 }
  0x3d   :  { %179 = vmatmul.f32.gmra.mxu0 %v48_v38 }
  0x3e   :  { %310 = vmatmul.f32.gmra.mxu1 %v49_v39 }
  0x45   :  { %182 = vmatmul.f32.gmra.mxu0 %v50_v40  ;;  %v80_v40 = vld [vmem:[#allocation2 + $0x130] sm:$0xff] }
  0x46   :  { %313 = vmatmul.f32.gmra.mxu1 %v51_v41  ;;  %v81_v41 = vld [vmem:[#allocation2 + $0x138] sm:$0xff] }
  0x4d   :  { %185 = vmatmul.f32.gmra.mxu0 %v52_v42 }
  0x4e   :  { %316 = vmatmul.f32.gmra.mxu1 %v53_v43 }
  0x55   :  { %188 = vmatmul.f32.gmra.mxu0 %v54_v44 }
  0x56   :  { %319 = vmatmul.f32.gmra.mxu1 %v55_v45 }
  0x5d   :  { %191 = vmatmul.f32.gmra.mxu0 %v56_v46 }
  0x5e   :  { %322 = vmatmul.f32.gmra.mxu1 %v57_v47  ;;  %v82_v47 = vld [vmem:[#allocation2 + $0x140] sm:$0xff] }
  0x65   :  { %194 = vmatmul.f32.gmra.mxu0 %v58_v48  ;;  %v83_v48 = vld [vmem:[#allocation2 + $0x148] sm:$0xff] }
  0x66   :  { %325 = vmatmul.f32.gmra.mxu1 %v59_v49 }
  0x6d   :  { %197 = vmatmul.f32.gmra.mxu0 %v60_v52 }
  0x6e   :  { %328 = vmatmul.f32.gmra.mxu1 %v61_v53 }
  0x75   :  { %200 = vmatmul.f32.gmra.mxu0 %v62_v58 }
  0x76   :  { %331 = vmatmul.f32.gmra.mxu1 %v63_v59 }
  0x7d   :  { %203 = vmatmul.f32.gmra.mxu0 %v64_v0 }
  0x7e   :  { %334 = vmatmul.f32.gmra.mxu1 %v65_v1 }
  0x85   :  { %206 = vmatmul.f32.gmra.mxu0 %v66_v5  ;;  %v89_v5 = vld [vmem:[#allocation2 + $0x178] sm:$0xff] }
  0x86   :  { %337 = vmatmul.f32.gmra.mxu1 %v67_v6 }
  0x8d   :  { %209 = vmatmul.f32.gmra.mxu0 %v68_v10 }
  0x8e   :  { %340 = vmatmul.f32.gmra.mxu1 %v69_v11  ;;  %v90_v11 = vld [vmem:[#allocation2 + $0x180] sm:$0xff] }
  0x95   :  { %212 = vmatmul.f32.gmra.mxu0 %v70_v12  ;;  %v91_v12 = vld [vmem:[#allocation2 + $0x188] sm:$0xff] }
  0x96   :  { %343 = vmatmul.f32.gmra.mxu1 %v71_v13 }
  0x9d   :  { %215 = vmatmul.f32.gmra.mxu0 %v72_v14 }
  0x9e   :  { %346 = vmatmul.f32.gmra.mxu1 %v73_v15 }
  0xa2   :  { %v171_v17 = vpop.f32.mrf.mxu0 }
  0xa3   :  { %v302_v18 = vpop.f32.mrf.mxu1  ;;  %v172_v21 = vadd.f32 %v1209_v16, %v171_v17 }
  0xa5   :  { %v303_v22 = vadd.f32 %v302_v18, %v172_v21  ;;  %218 = vmatmul.f32.gmra.mxu0 %v74_v19  ;;  %v92_v19 = vld [vmem:[#allocation2 + $0x190] sm:$0xff] }
  0xa6   :  { %349 = vmatmul.f32.gmra.mxu1 %v75_v20  ;;  %v93_v20 = vld [vmem:[#allocation2 + $0x198] sm:$0xff] }
  0xa7   :  { %v416_v23 = vmax.f32 %v303_v22, 0.0 }
  0xa9   :  { %490 = vmatmul.f32.vlgmr.msra.gmra.mxu2 %v416_v23 }
  0xaa   :  { %v174_v24 = vpop.f32.mrf.mxu0 }
  0xab   :  { %v305_v25 = vpop.f32.mrf.mxu1  ;;  %v175_v28 = vadd.f32 %v1209_v16, %v174_v24 }
  0xad   :  { %v306_v29 = vadd.f32 %v305_v25, %v175_v28  ;;  %221 = vmatmul.f32.gmra.mxu0 %v76_v26  ;;  %v94_v26 = vld [vmem:[#allocation2 + $0x1a0] sm:$0xff] }
  0xae   :  { %352 = vmatmul.f32.gmra.mxu1 %v77_v27  ;;  %v95_v27 = vld [vmem:[#allocation2 + $0x1a8] sm:$0xff] }
  0xaf   :  { %v417_v30 = vmax.f32 %v306_v29, 0.0 }
  0xb1   :  { %493 = vmatmul.f32.gmra.mxu2 %v417_v30 }
  0xb2   :  { %v177_v31 = vpop.f32.mrf.mxu0 }
  0xb3   :  { %v308_v32 = vpop.f32.mrf.mxu1  ;;  %v178_v35 = vadd.f32 %v1209_v16, %v177_v31 }
  0xb5   :  { %v309_v36 = vadd.f32 %v308_v32, %v178_v35  ;;  %224 = vmatmul.f32.gmra.mxu0 %v78_v33  ;;  %v96_v33 = vld [vmem:[#allocation2 + $0x1b0] sm:$0xff] }
  0xb6   :  { %355 = vmatmul.f32.gmra.mxu1 %v79_v34  ;;  %v97_v34 = vld [vmem:[#allocation2 + $0x1b8] sm:$0xff] }
  0xb7   :  { %v418_v37 = vmax.f32 %v309_v36, 0.0 }
  0xb9   :  { %496 = vmatmul.f32.gmra.mxu2 %v418_v37 }
  0xba   :  { %v180_v38 = vpop.f32.mrf.mxu0 }
  0xbb   :  { %v311_v39 = vpop.f32.mrf.mxu1  ;;  %v181_v42 = vadd.f32 %v1209_v16, %v180_v38  ;;  %v650_v38 = vld [vmem:[%s1553_s5 + $0x38] sm:$0xff] }
  0xbc   :  { %778 = vmatpush.msra.mxu3 %v650_v38 }
  0xbd   :  { %v312_v43 = vadd.f32 %v311_v39, %v181_v42  ;;  %227 = vmatmul.f32.gmra.mxu0 %v80_v40  ;;  %v99_v42 = vld [vmem:[#allocation2 + $0x1c8] sm:$0xff] }
  0xbe   :  { %358 = vmatmul.f32.gmra.mxu1 %v81_v41  ;;  %v98_v41 = vld [vmem:[#allocation2 + $0x1c0] sm:$0xff] }
  0xbf   :  { %v419_v44 = vmax.f32 %v312_v43, 0.0 }
  0xc1   :  { %499 = vmatmul.f32.gmra.mxu2 %v419_v44  ;;  %v649_v44 = vld [vmem:[%s1553_s5 + $0x30] sm:$0xff] }
  0xc2   :  { %v183_v45 = vpop.f32.mrf.mxu0  ;;  %779 = vmatpush.msra.mxu3 %v649_v44 }
  0xc3   :  { %v314_v46 = vpop.f32.mrf.mxu1  ;;  %v184_v49 = vadd.f32 %v1209_v16, %v183_v45 }
  0xc5   :  { %v315_v50 = vadd.f32 %v314_v46, %v184_v49  ;;  %230 = vmatmul.f32.gmra.mxu0 %v82_v47  ;;  %v648_v46 = vld [vmem:[%s1553_s5 + $0x28] sm:$0xff]  ;;  %v646_v49 = vld [vmem:[%s1553_s5 + $0x18] sm:$0xff] }
  0xc6   :  { %361 = vmatmul.f32.gmra.mxu1 %v83_v48  ;;  %780 = vmatpush.msra.mxu3 %v648_v46  ;;  %v647_v48 = vld [vmem:[%s1553_s5 + $0x20] sm:$0xff] }
  0xc7   :  { %v420_v51 = vmax.f32 %v315_v50, 0.0 }
  0xc8   :  { %781 = vmatpush.msra.mxu3 %v647_v48 }
  0xc9   :  { %502 = vmatmul.f32.gmra.mxu2 %v420_v51 }
  0xca   :  { %v186_v52 = vpop.f32.mrf.mxu0  ;;  %782 = vmatpush.msra.mxu3 %v646_v49 }
  0xcb   :  { %v317_v53 = vpop.f32.mrf.mxu1  ;;  %v187_v56 = vadd.f32 %v1209_v16, %v186_v52  ;;  %v100_v52 = vld [vmem:[#allocation2 + $0x1d0] sm:$0xff] }
  0xcd   :  { %v318_v57 = vadd.f32 %v317_v53, %v187_v56  ;;  %233 = vmatmul.f32.gmra.mxu0 %v84_v54  ;;  %v101_v53 = vld [vmem:[#allocation2 + $0x1d8] sm:$0xff] }
  0xce   :  { %364 = vmatmul.f32.gmra.mxu1 %v85_v55  ;;  %v645_v55 = vld [vmem:[%s1553_s5 + $0x10] sm:$0xff] }
  0xcf   :  { %v421_v58 = vmax.f32 %v318_v57, 0.0  ;;  %783 = vmatpush.msra.mxu3 %v645_v55  ;;  %v644_v57 = vld [vmem:[%s1553_s5 + $0x8] sm:$0xff] }
  0xd1   :  { %505 = vmatmul.f32.gmra.mxu2 %v421_v58  ;;  %784 = vmatpush.msra.mxu3 %v644_v57 }
  0xd2   :  { %v189_v59 = vpop.f32.mrf.mxu0 }
  0xd3   :  { %v320_v60 = vpop.f32.mrf.mxu1  ;;  %v190_v63 = vadd.f32 %v1209_v16, %v189_v59  ;;  %v643_v59 = vld [vmem:[%s1553_s5] sm:$0xff] }
  0xd4   :  { %785 = vmatpush.msra.mxu3 %v643_v59 }
  0xd5   :  { %v321_v0 = vadd.f32 %v320_v60, %v190_v63  ;;  %236 = vmatmul.f32.gmra.mxu0 %v86_v61  ;;  %v103_v63 = vld [vmem:[#allocation2 + $0x1e8] sm:$0xff] }
  0xd6   :  { %367 = vmatmul.f32.gmra.mxu1 %v87_v62  ;;  %v102_v62 = vld [vmem:[#allocation2 + $0x1e0] sm:$0xff] }
  0xd7   :  { %v422_v1 = vmax.f32 %v321_v0, 0.0 }
  0xd9   :  { %508 = vmatmul.f32.gmra.mxu2 %v422_v1 }
  0xda   :  { %v192_v2 = vpop.f32.mrf.mxu0 }
  0xdb   :  { %v323_v3 = vpop.f32.mrf.mxu1  ;;  %v193_v6 = vadd.f32 %v1209_v16, %v192_v2 }
  0xdd   :  { %v324_v7 = vadd.f32 %v323_v3, %v193_v6  ;;  %239 = vmatmul.f32.gmra.mxu0 %v88_v4  ;;  %v105_v6 = vld [vmem:[#allocation2 + $0x1f8] sm:$0xff] }
  0xde   :  { %370 = vmatmul.f32.gmra.mxu1 %v89_v5  ;;  %v104_v5 = vld [vmem:[#allocation2 + $0x1f0] sm:$0xff] }
  0xdf   :  { %v423_v8 = vmax.f32 %v324_v7, 0.0 }
  0xe1   :  { %511 = vmatmul.f32.gmra.mxu2 %v423_v8 }
  0xe2   :  { %v195_v9 = vpop.f32.mrf.mxu0 }
  0xe3   :  { %v326_v10 = vpop.f32.mrf.mxu1  ;;  %v196_v13 = vadd.f32 %v1209_v16, %v195_v9 }
  0xe5   :  { %v327_v14 = vadd.f32 %v326_v10, %v196_v13  ;;  %242 = vmatmul.f32.gmra.mxu0 %v90_v11  ;;  %v107_v13 = vld [vmem:[#allocation2 + $0x208] sm:$0xff] }
  0xe6   :  { %373 = vmatmul.f32.gmra.mxu1 %v91_v12  ;;  %v106_v12 = vld [vmem:[#allocation2 + $0x200] sm:$0xff] }
  0xe7   :  { %v424_v15 = vmax.f32 %v327_v14, 0.0 }
  0xe9   :  { %514 = vmatmul.f32.gmra.mxu2 %v424_v15 }
  0xea   :  { %v198_v17 = vpop.f32.mrf.mxu0 }
  0xeb   :  { %v329_v18 = vpop.f32.mrf.mxu1  ;;  %v199_v21 = vadd.f32 %v1209_v16, %v198_v17 }
  0xed   :  { %v330_v22 = vadd.f32 %v329_v18, %v199_v21  ;;  %245 = vmatmul.f32.gmra.mxu0 %v92_v19  ;;  %v1255_v18 = vld [vmem:[%s1552_s4] ss:$0 sm:$0xff]  ;;  %v108_v21 = vld [vmem:[#allocation2 + $0x210] sm:$0xff] }
  0xee   :  { %376 = vmatmul.f32.gmra.mxu1 %v93_v20 }
  0xef   :  { %v425_v23 = vmax.f32 %v330_v22, 0.0  ;;  %v109_v22 = vld [vmem:[#allocation2 + $0x218] sm:$0xff] }
  0xf1   :  { %517 = vmatmul.f32.gmra.mxu2 %v425_v23 }
  0xf2   :  { %v201_v24 = vpop.f32.mrf.mxu0 }
  0xf3   :  { %v332_v25 = vpop.f32.mrf.mxu1  ;;  %v202_v28 = vadd.f32 %v1209_v16, %v201_v24 }
  0xf5   :  { %v333_v29 = vadd.f32 %v332_v25, %v202_v28  ;;  %248 = vmatmul.f32.gmra.mxu0 %v94_v26 }
  0xf6   :  { %379 = vmatmul.f32.gmra.mxu1 %v95_v27 }
  0xf7   :  { %v426_v30 = vmax.f32 %v333_v29, 0.0 }
  0xf9   :  { %520 = vmatmul.f32.gmra.mxu2 %v426_v30 }
  0xfa   :  { %v204_v31 = vpop.f32.mrf.mxu0 }
  0xfb   :  { %v335_v32 = vpop.f32.mrf.mxu1  ;;  %v205_v35 = vadd.f32 %v1209_v16, %v204_v31  ;;  %v110_v31 = vld [vmem:[#allocation2 + $0x220] sm:$0xff] }
  0xfd   :  { %v336_v36 = vadd.f32 %v335_v32, %v205_v35  ;;  %251 = vmatmul.f32.gmra.mxu0 %v96_v33  ;;  %v111_v32 = vld [vmem:[#allocation2 + $0x228] sm:$0xff] }
  0xfe   :  { %382 = vmatmul.f32.gmra.mxu1 %v97_v34 }
  0xff   :  { %v427_v37 = vmax.f32 %v336_v36, 0.0 }
 0x101   :  { %523 = vmatmul.f32.gmra.mxu2 %v427_v37 }
 0x102   :  { %v207_v39 = vpop.f32.mrf.mxu0 }
 0x103   :  { %v338_v40 = vpop.f32.mrf.mxu1  ;;  %v208_v43 = vadd.f32 %v1209_v16, %v207_v39 }
 0x105   :  { %v339_v45 = vadd.f32 %v338_v40, %v208_v43  ;;  %254 = vmatmul.f32.gmra.mxu0 %v98_v41  ;;  %v112_v41 = vld [vmem:[#allocation2 + $0x230] sm:$0xff] }
 0x106   :  { %385 = vmatmul.f32.gmra.mxu1 %v99_v42  ;;  %v113_v42 = vld [vmem:[#allocation2 + $0x238] sm:$0xff] }
 0x107   :  { %v428_v47 = vmax.f32 %v339_v45, 0.0 }
 0x109   :  { %526 = vmatmul.f32.gmra.mxu2 %v428_v47 }
 0x10a   :  { %v210_v50 = vpop.f32.mrf.mxu0 }
 0x10b   :  { %v341_v51 = vpop.f32.mrf.mxu1  ;;  %v211_v54 = vadd.f32 %v1209_v16, %v210_v50 }
 0x10d   :  { %v342_v56 = vadd.f32 %v341_v51, %v211_v54  ;;  %257 = vmatmul.f32.gmra.mxu0 %v100_v52  ;;  %v114_v51 = vld [vmem:[#allocation2 + $0x240] sm:$0xff]  ;;  %v115_v52 = vld [vmem:[#allocation2 + $0x248] sm:$0xff] }
 0x10e   :  { %388 = vmatmul.f32.gmra.mxu1 %v101_v53 }
 0x10f   :  { %v429_v58 = vmax.f32 %v342_v56, 0.0 }
 0x111   :  { %529 = vmatmul.f32.gmra.mxu2 %v429_v58 }
 0x112   :  { %v213_v60 = vpop.f32.mrf.mxu0 }
 0x113   :  { %v344_v61 = vpop.f32.mrf.mxu1  ;;  %v214_v0 = vadd.f32 %v1209_v16, %v213_v60 }
 0x115   :  { %v345_v1 = vadd.f32 %v344_v61, %v214_v0  ;;  %260 = vmatmul.f32.gmra.mxu0 %v102_v62  ;;  %v116_v61 = vld [vmem:[#allocation2 + $0x250] sm:$0xf]  ;;  %v117_v62 = vld [vmem:[#allocation2 + $0x258] sm:$0xf] }
 0x116   :  { %391 = vmatmul.f32.gmra.mxu1 %v103_v63 }
 0x117   :  { %v430_v2 = vmax.f32 %v345_v1, 0.0 }
 0x119   :  { %532 = vmatmul.f32.gmra.mxu2 %v430_v2 }
 0x11a   :  { %v216_v3 = vpop.f32.mrf.mxu0 }
 0x11b   :  { %v347_v4 = vpop.f32.mrf.mxu1  ;;  %v217_v7 = vadd.f32 %v1209_v16, %v216_v3 }
 0x11d   :  { %v348_v8 = vadd.f32 %v347_v4, %v217_v7  ;;  %263 = vmatmul.f32.gmra.mxu0 %v104_v5 }
 0x11e   :  { %394 = vmatmul.f32.gmra.mxu1 %v105_v6 }
 0x11f   :  { %v431_v9 = vmax.f32 %v348_v8, 0.0 }
 0x121   :  { %535 = vmatmul.f32.gmra.mxu2 %v431_v9 }
 0x122   :  { %v219_v10 = vpop.f32.mrf.mxu0 }
 0x123   :  { %v350_v11 = vpop.f32.mrf.mxu1  ;;  %v220_v14 = vadd.f32 %v1209_v16, %v219_v10 }
 0x125   :  { %v351_v15 = vadd.f32 %v350_v11, %v220_v14  ;;  %266 = vmatmul.f32.gmra.mxu0 %v106_v12 }
 0x126   :  { %397 = vmatmul.f32.gmra.mxu1 %v107_v13 }
 0x127   :  { %v432_v17 = vmax.f32 %v351_v15, 0.0 }
 0x129   :  { %538 = vmatmul.f32.gmra.mxu2 %v432_v17 }
 0x12a   :  { %v222_v19 = vpop.f32.mrf.mxu0 }
 0x12b   :  { %v353_v20 = vpop.f32.mrf.mxu1  ;;  %v223_v23 = vadd.f32 %v1209_v16, %v222_v19 }
 0x12c   :  { %v491_v24 = vpop.f32.mrf.mxu2 }
 0x12d   :  { %v354_v25 = vadd.f32 %v353_v20, %v223_v23  ;;  %v492_v26 = vadd.f32 %v1255_v18, %v491_v24  ;;  %269 = vmatmul.f32.gmra.mxu0 %v108_v21 }
 0x12e   :  { %400 = vmatmul.f32.gmra.mxu1 %v109_v22 }
 0x12f   :  { %v433_v27 = vmax.f32 %v354_v25, 0.0  ;;  %v605_v28 = vmax.f32 %v492_v26, 0.0 }
 0x131   :  { %541 = vmatmul.f32.gmra.mxu2 %v433_v27  ;;  %946 = vmatmul.msk.f32.vlgmr.msra.gmra.mxu3 %vm655_vm0, %v605_v28 }
 0x132   :  { %v225_v29 = vpop.f32.mrf.mxu0 }
 0x133   :  { %v356_v30 = vpop.f32.mrf.mxu1  ;;  %v226_v33 = vadd.f32 %v1209_v16, %v225_v29 }
 0x134   :  { %v494_v34 = vpop.f32.mrf.mxu2 }
 0x135   :  { %v357_v35 = vadd.f32 %v356_v30, %v226_v33  ;;  %v495_v36 = vadd.f32 %v1255_v18, %v494_v34  ;;  %272 = vmatmul.f32.gmra.mxu0 %v110_v31 }
 0x136   :  { %403 = vmatmul.f32.gmra.mxu1 %v111_v32 }
 0x137   :  { %v434_v37 = vmax.f32 %v357_v35, 0.0  ;;  %v606_v38 = vmax.f32 %v495_v36, 0.0 }
 0x139   :  { %544 = vmatmul.f32.gmra.mxu2 %v434_v37  ;;  %947 = vmatmul.msk.f32.gmra.mxu3 %vm655_vm0, %v606_v38 }
 0x13a   :  { %v228_v39 = vpop.f32.mrf.mxu0 }
 0x13b   :  { %v359_v40 = vpop.f32.mrf.mxu1  ;;  %v229_v43 = vadd.f32 %v1209_v16, %v228_v39 }
 0x13c   :  { %v497_v44 = vpop.f32.mrf.mxu2 }
 0x13d   :  { %v360_v45 = vadd.f32 %v359_v40, %v229_v43  ;;  %v498_v46 = vadd.f32 %v1255_v18, %v497_v44  ;;  %275 = vmatmul.f32.gmra.mxu0 %v112_v41 }
 0x13e   :  { %406 = vmatmul.f32.gmra.mxu1 %v113_v42 }
 0x13f   :  { %v435_v47 = vmax.f32 %v360_v45, 0.0  ;;  %v607_v48 = vmax.f32 %v498_v46, 0.0 }
 0x141   :  { %547 = vmatmul.f32.gmra.mxu2 %v435_v47  ;;  %948 = vmatmul.msk.f32.gmra.mxu3 %vm655_vm0, %v607_v48 }
 0x142   :  { %v231_v49 = vpop.f32.mrf.mxu0 }
 0x143   :  { %v362_v50 = vpop.f32.mrf.mxu1  ;;  %v232_v53 = vadd.f32 %v1209_v16, %v231_v49 }
 0x144   :  { %v500_v54 = vpop.f32.mrf.mxu2 }
 0x145   :  { %v363_v55 = vadd.f32 %v362_v50, %v232_v53  ;;  %v501_v56 = vadd.f32 %v1255_v18, %v500_v54  ;;  %278 = vmatmul.f32.gmra.mxu0 %v114_v51 }
 0x146   :  { %409 = vmatmul.f32.gmra.mxu1 %v115_v52 }
 0x147   :  { %v436_v57 = vmax.f32 %v363_v55, 0.0  ;;  %v608_v58 = vmax.f32 %v501_v56, 0.0 }
 0x149   :  { %550 = vmatmul.f32.gmra.mxu2 %v436_v57  ;;  %949 = vmatmul.msk.f32.gmra.mxu3 %vm655_vm0, %v608_v58 }
 0x14a   :  { %v234_v59 = vpop.f32.mrf.mxu0 }
 0x14b   :  { %v365_v60 = vpop.f32.mrf.mxu1  ;;  %v235_v63 = vadd.f32 %v1209_v16, %v234_v59 }
 0x14c   :  { %v503_v0 = vpop.f32.mrf.mxu2 }
 0x14d   :  { %v366_v1 = vadd.f32 %v365_v60, %v235_v63  ;;  %v504_v2 = vadd.f32 %v1255_v18, %v503_v0  ;;  %281 = vmatmul.f32.gmra.mxu0 %v116_v61 }
 0x14e   :  { %412 = vmatmul.f32.gmra.mxu1 %v117_v62 }
 0x14f   :  { %v437_v3 = vmax.f32 %v366_v1, 0.0  ;;  %v609_v4 = vmax.f32 %v504_v2, 0.0 }
 0x151   :  { %553 = vmatmul.f32.gmra.mxu2 %v437_v3  ;;  %950 = vmatmul.msk.f32.gmra.mxu3 %vm655_vm0, %v609_v4 }
 0x152   :  { %v237_v5 = vpop.f32.mrf.mxu0 }
 0x153   :  { %v368_v6 = vpop.f32.mrf.mxu1  ;;  %v238_v7 = vadd.f32 %v1209_v16, %v237_v5 }
 0x154   :  { %v506_v8 = vpop.f32.mrf.mxu2 }
 0x155   :  { %v369_v9 = vadd.f32 %v368_v6, %v238_v7  ;;  %v507_v10 = vadd.f32 %v1255_v18, %v506_v8 }
 0x157   :  { %v438_v11 = vmax.f32 %v369_v9, 0.0  ;;  %v610_v12 = vmax.f32 %v507_v10, 0.0 }
 0x159   :  { %556 = vmatmul.f32.gmra.mxu2 %v438_v11  ;;  %951 = vmatmul.msk.f32.gmra.mxu3 %vm655_vm0, %v610_v12 }
 0x15a   :  { %v240_v13 = vpop.f32.mrf.mxu0 }
 0x15b   :  { %v371_v14 = vpop.f32.mrf.mxu1  ;;  %v241_v15 = vadd.f32 %v1209_v16, %v240_v13 }
 0x15c   :  { %v509_v17 = vpop.f32.mrf.mxu2 }
 0x15d   :  { %v372_v19 = vadd.f32 %v371_v14, %v241_v15  ;;  %v510_v20 = vadd.f32 %v1255_v18, %v509_v17 }
 0x15f   :  { %v439_v21 = vmax.f32 %v372_v19, 0.0  ;;  %v611_v22 = vmax.f32 %v510_v20, 0.0 }
 0x161   :  { %559 = vmatmul.f32.gmra.mxu2 %v439_v21  ;;  %952 = vmatmul.msk.f32.gmra.mxu3 %vm655_vm0, %v611_v22 }
 0x162   :  { %v243_v23 = vpop.f32.mrf.mxu0 }
 0x163   :  { %v374_v24 = vpop.f32.mrf.mxu1  ;;  %v244_v25 = vadd.f32 %v1209_v16, %v243_v23 }
 0x164   :  { %v512_v26 = vpop.f32.mrf.mxu2 }
 0x165   :  { %v375_v27 = vadd.f32 %v374_v24, %v244_v25  ;;  %v513_v28 = vadd.f32 %v1255_v18, %v512_v26 }
 0x167   :  { %v440_v29 = vmax.f32 %v375_v27, 0.0  ;;  %v612_v30 = vmax.f32 %v513_v28, 0.0 }
 0x169   :  { %562 = vmatmul.f32.gmra.mxu2 %v440_v29  ;;  %953 = vmatmul.msk.f32.gmra.mxu3 %vm655_vm0, %v612_v30 }
 0x16a   :  { %v246_v31 = vpop.f32.mrf.mxu0 }
 0x16b   :  { %v377_v32 = vpop.f32.mrf.mxu1  ;;  %v247_v33 = vadd.f32 %v1209_v16, %v246_v31 }
 0x16c   :  { %v515_v34 = vpop.f32.mrf.mxu2 }
 0x16d   :  { %v378_v35 = vadd.f32 %v377_v32, %v247_v33  ;;  %v516_v36 = vadd.f32 %v1255_v18, %v515_v34 }
 0x16f   :  { %v441_v37 = vmax.f32 %v378_v35, 0.0  ;;  %v613_v38 = vmax.f32 %v516_v36, 0.0 }
 0x171   :  { %565 = vmatmul.f32.gmra.mxu2 %v441_v37  ;;  %954 = vmatmul.msk.f32.gmra.mxu3 %vm655_vm0, %v613_v38 }
 0x172   :  { %v249_v39 = vpop.f32.mrf.mxu0 }
 0x173   :  { %v380_v40 = vpop.f32.mrf.mxu1  ;;  %v250_v41 = vadd.f32 %v1209_v16, %v249_v39 }
 0x174   :  { %v518_v42 = vpop.f32.mrf.mxu2 }
 0x175   :  { %v381_v43 = vadd.f32 %v380_v40, %v250_v41  ;;  %v519_v44 = vadd.f32 %v1255_v18, %v518_v42  ;;  %v1311_v41 = vld [vmem:[%s1554_s6] ss:$0 sm:$0xff] }
 0x177   :  { %v442_v45 = vmax.f32 %v381_v43, 0.0  ;;  %v614_v46 = vmax.f32 %v519_v44, 0.0 }
 0x179   :  { %568 = vmatmul.f32.gmra.mxu2 %v442_v45  ;;  %955 = vmatmul.msk.f32.gmra.mxu3 %vm655_vm0, %v614_v46 }
 0x17a   :  { %v252_v47 = vpop.f32.mrf.mxu0 }
 0x17b   :  { %v383_v48 = vpop.f32.mrf.mxu1  ;;  %v253_v49 = vadd.f32 %v1209_v16, %v252_v47 }
 0x17c   :  { %v521_v50 = vpop.f32.mrf.mxu2 }
 0x17d   :  { %v384_v51 = vadd.f32 %v383_v48, %v253_v49  ;;  %v522_v52 = vadd.f32 %v1255_v18, %v521_v50 }
 0x17f   :  { %v443_v53 = vmax.f32 %v384_v51, 0.0  ;;  %v615_v54 = vmax.f32 %v522_v52, 0.0 }
 0x181   :  { %571 = vmatmul.f32.gmra.mxu2 %v443_v53  ;;  %956 = vmatmul.msk.f32.gmra.mxu3 %vm655_vm0, %v615_v54 }
 0x182   :  { %v255_v55 = vpop.f32.mrf.mxu0 }
 0x183   :  { %v386_v56 = vpop.f32.mrf.mxu1  ;;  %v256_v57 = vadd.f32 %v1209_v16, %v255_v55 }
 0x184   :  { %v524_v58 = vpop.f32.mrf.mxu2 }
 0x185   :  { %v387_v59 = vadd.f32 %v386_v56, %v256_v57  ;;  %v525_v60 = vadd.f32 %v1255_v18, %v524_v58 }
 0x187   :  { %v444_v61 = vmax.f32 %v387_v59, 0.0  ;;  %v616_v62 = vmax.f32 %v525_v60, 0.0 }
 0x189   :  { %574 = vmatmul.f32.gmra.mxu2 %v444_v61  ;;  %957 = vmatmul.msk.f32.gmra.mxu3 %vm655_vm0, %v616_v62 }
 0x18a   :  { %v258_v63 = vpop.f32.mrf.mxu0 }
 0x18b   :  { %v389_v0 = vpop.f32.mrf.mxu1  ;;  %v259_v1 = vadd.f32 %v1209_v16, %v258_v63 }
 0x18c   :  { %v527_v2 = vpop.f32.mrf.mxu2 }
 0x18d   :  { %v390_v3 = vadd.f32 %v389_v0, %v259_v1  ;;  %v528_v4 = vadd.f32 %v1255_v18, %v527_v2 }
 0x18f   :  { %v445_v5 = vmax.f32 %v390_v3, 0.0  ;;  %v617_v6 = vmax.f32 %v528_v4, 0.0 }
 0x191   :  { %577 = vmatmul.f32.gmra.mxu2 %v445_v5  ;;  %958 = vmatmul.msk.f32.gmra.mxu3 %vm655_vm0, %v617_v6 }
 0x192   :  { %v261_v7 = vpop.f32.mrf.mxu0 }
 0x193   :  { %v392_v8 = vpop.f32.mrf.mxu1  ;;  %v262_v9 = vadd.f32 %v1209_v16, %v261_v7 }
 0x194   :  { %v530_v10 = vpop.f32.mrf.mxu2 }
 0x195   :  { %v393_v11 = vadd.f32 %v392_v8, %v262_v9  ;;  %v531_v12 = vadd.f32 %v1255_v18, %v530_v10 }
 0x197   :  { %v446_v13 = vmax.f32 %v393_v11, 0.0  ;;  %v618_v14 = vmax.f32 %v531_v12, 0.0 }
 0x199   :  { %580 = vmatmul.f32.gmra.mxu2 %v446_v13  ;;  %959 = vmatmul.msk.f32.gmra.mxu3 %vm655_vm0, %v618_v14 }
 0x19a   :  { %v264_v15 = vpop.f32.mrf.mxu0 }
 0x19b   :  { %v395_v17 = vpop.f32.mrf.mxu1  ;;  %v265_v19 = vadd.f32 %v1209_v16, %v264_v15 }
 0x19c   :  { %v533_v20 = vpop.f32.mrf.mxu2 }
 0x19d   :  { %v396_v21 = vadd.f32 %v395_v17, %v265_v19  ;;  %v534_v22 = vadd.f32 %v1255_v18, %v533_v20 }
 0x19f   :  { %v447_v23 = vmax.f32 %v396_v21, 0.0  ;;  %v619_v24 = vmax.f32 %v534_v22, 0.0 }
 0x1a1   :  { %583 = vmatmul.f32.gmra.mxu2 %v447_v23  ;;  %960 = vmatmul.msk.f32.gmra.mxu3 %vm655_vm0, %v619_v24 }
 0x1a2   :  { %v267_v25 = vpop.f32.mrf.mxu0 }
 0x1a3   :  { %v398_v26 = vpop.f32.mrf.mxu1  ;;  %v268_v27 = vadd.f32 %v1209_v16, %v267_v25 }
 0x1a4   :  { %v536_v28 = vpop.f32.mrf.mxu2 }
 0x1a5   :  { %v399_v29 = vadd.f32 %v398_v26, %v268_v27  ;;  %v537_v30 = vadd.f32 %v1255_v18, %v536_v28 }
 0x1a7   :  { %v448_v31 = vmax.f32 %v399_v29, 0.0  ;;  %v620_v32 = vmax.f32 %v537_v30, 0.0 }
 0x1a9   :  { %586 = vmatmul.f32.gmra.mxu2 %v448_v31  ;;  %961 = vmatmul.msk.f32.gmra.mxu3 %vm655_vm0, %v620_v32 }
 0x1aa   :  { %v270_v33 = vpop.f32.mrf.mxu0 }
 0x1ab   :  { %v401_v34 = vpop.f32.mrf.mxu1  ;;  %v271_v35 = vadd.f32 %v1209_v16, %v270_v33 }
 0x1ac   :  { %v539_v36 = vpop.f32.mrf.mxu2 }
 0x1ad   :  { %v402_v37 = vadd.f32 %v401_v34, %v271_v35  ;;  %v540_v38 = vadd.f32 %v1255_v18, %v539_v36 }
 0x1af   :  { %v449_v39 = vmax.f32 %v402_v37, 0.0  ;;  %v621_v40 = vmax.f32 %v540_v38, 0.0 }
 0x1b1   :  { %589 = vmatmul.f32.gmra.mxu2 %v449_v39  ;;  %962 = vmatmul.msk.f32.gmra.mxu3 %vm655_vm0, %v621_v40 }
 0x1b2   :  { %v273_v42 = vpop.f32.mrf.mxu0 }
 0x1b3   :  { %v404_v43 = vpop.f32.mrf.mxu1  ;;  %v274_v44 = vadd.f32 %v1209_v16, %v273_v42 }
 0x1b4   :  { %v542_v45 = vpop.f32.mrf.mxu2  ;;  %v787_v46 = vpop.f32.mrf.mxu3 }
 0x1b5   :  { %v405_v47 = vadd.f32 %v404_v43, %v274_v44  ;;  %v543_v48 = vadd.f32 %v1255_v18, %v542_v45  ;;  %v788_v49 = vadd.f32 %v1311_v41, %v787_v46 }
 0x1b7   :  { %v450_v50 = vmax.f32 %v405_v47, 0.0  ;;  %v622_v51 = vmax.f32 %v543_v48, 0.0  ;;  %902 = vst.msk [vmem:[%s1555_s7] sm:$0xff] %vm901_vm1, %v788_v49 }
 0x1b9   :  { %592 = vmatmul.f32.gmra.mxu2 %v450_v50  ;;  %963 = vmatmul.msk.f32.gmra.mxu3 %vm655_vm0, %v622_v51 }
 0x1ba   :  { %v276_v52 = vpop.f32.mrf.mxu0 }
 0x1bb   :  { %v407_v53 = vpop.f32.mrf.mxu1  ;;  %v277_v54 = vadd.f32 %v1209_v16, %v276_v52 }
 0x1bc   :  { %v545_v55 = vpop.f32.mrf.mxu2  ;;  %v790_v56 = vpop.f32.mrf.mxu3 }
 0x1bd   :  { %v408_v57 = vadd.f32 %v407_v53, %v277_v54  ;;  %v546_v58 = vadd.f32 %v1255_v18, %v545_v55  ;;  %v791_v59 = vadd.f32 %v1311_v41, %v790_v56 }
 0x1bf   :  { %v451_v60 = vmax.f32 %v408_v57, 0.0  ;;  %v623_v61 = vmax.f32 %v546_v58, 0.0  ;;  %903 = vst.msk [vmem:[%s1555_s7 + $0x8] sm:$0xff] %vm901_vm1, %v791_v59 }
 0x1c1   :  { %595 = vmatmul.f32.gmra.mxu2 %v451_v60  ;;  %964 = vmatmul.msk.f32.gmra.mxu3 %vm655_vm0, %v623_v61 }
 0x1c2   :  { %v279_v62 = vpop.f32.mrf.mxu0 }
 0x1c3   :  { %v410_v63 = vpop.f32.mrf.mxu1  ;;  %v280_v0 = vadd.f32 %v1209_v16, %v279_v62 }
 0x1c4   :  { %v548_v1 = vpop.f32.mrf.mxu2  ;;  %v793_v2 = vpop.f32.mrf.mxu3 }
 0x1c5   :  { %v411_v3 = vadd.f32 %v410_v63, %v280_v0  ;;  %v549_v4 = vadd.f32 %v1255_v18, %v548_v1  ;;  %v794_v5 = vadd.f32 %v1311_v41, %v793_v2 }
 0x1c7   :  { %v452_v6 = vmax.f32 %v411_v3, 0.0  ;;  %v624_v7 = vmax.f32 %v549_v4, 0.0  ;;  %904 = vst.msk [vmem:[%s1555_s7 + $0x10] sm:$0xff] %vm901_vm1, %v794_v5 }
 0x1c9   :  { %598 = vmatmul.f32.gmra.mxu2 %v452_v6  ;;  %965 = vmatmul.msk.f32.gmra.mxu3 %vm655_vm0, %v624_v7 }
 0x1ca   :  { %v282_v8 = vpop.f32.mrf.mxu0 }
 0x1cb   :  { %v413_v9 = vpop.f32.mrf.mxu1  ;;  %v283_v10 = vadd.f32 %v1209_v16, %v282_v8 }
 0x1cc   :  { %v551_v11 = vpop.f32.mrf.mxu2  ;;  %v796_v12 = vpop.f32.mrf.mxu3 }
 0x1cd   :  { %v414_v13 = vadd.f32 %v413_v9, %v283_v10  ;;  %v552_v14 = vadd.f32 %v1255_v18, %v551_v11  ;;  %v797_v15 = vadd.f32 %v1311_v41, %v796_v12 }
 0x1cf   :  { %v453_v17 = vmax.f32 %v414_v13, 0.0  ;;  %v625_v19 = vmax.f32 %v552_v14, 0.0  ;;  %905 = vst.msk [vmem:[%s1555_s7 + $0x18] sm:$0xff] %vm901_vm1, %v797_v15 }
 0x1d1   :  { %601 = vmatmul.f32.gmra.mxu2 %v453_v17  ;;  %966 = vmatmul.msk.f32.gmra.mxu3 %vm655_vm0, %v625_v19 }
 0x1d4   :  { %v554_v20 = vpop.f32.mrf.mxu2  ;;  %v799_v21 = vpop.f32.mrf.mxu3 }
 0x1d5   :  { %v555_v16 = vadd.f32 %v1255_v18, %v554_v20  ;;  %v800_v22 = vadd.f32 %v1311_v41, %v799_v21 }
 0x1d7   :  { %v626_v23 = vmax.f32 %v555_v16, 0.0  ;;  %906 = vst.msk [vmem:[%s1555_s7 + $0x20] sm:$0xff] %vm901_vm1, %v800_v22 }
 0x1d9   :  { %967 = vmatmul.msk.f32.gmra.mxu3 %vm655_vm0, %v626_v23 }
 0x1dc   :  { %v557_v24 = vpop.f32.mrf.mxu2  ;;  %v802_v25 = vpop.f32.mrf.mxu3 }
 0x1dd   :  { %v558_v26 = vadd.f32 %v1255_v18, %v557_v24  ;;  %v803_v27 = vadd.f32 %v1311_v41, %v802_v25 }
 0x1df   :  { %v627_v28 = vmax.f32 %v558_v26, 0.0  ;;  %907 = vst.msk [vmem:[%s1555_s7 + $0x28] sm:$0xff] %vm901_vm1, %v803_v27 }
 0x1e1   :  { %968 = vmatmul.msk.f32.gmra.mxu3 %vm655_vm0, %v627_v28 }
 0x1e4   :  { %v560_v29 = vpop.f32.mrf.mxu2  ;;  %v805_v30 = vpop.f32.mrf.mxu3 }
 0x1e5   :  { %v561_v31 = vadd.f32 %v1255_v18, %v560_v29  ;;  %v806_v32 = vadd.f32 %v1311_v41, %v805_v30 }
 0x1e7   :  { %v628_v33 = vmax.f32 %v561_v31, 0.0  ;;  %908 = vst.msk [vmem:[%s1555_s7 + $0x30] sm:$0xff] %vm901_vm1, %v806_v32 }
 0x1e9   :  { %969 = vmatmul.msk.f32.gmra.mxu3 %vm655_vm0, %v628_v33 }
 0x1ec   :  { %v563_v34 = vpop.f32.mrf.mxu2  ;;  %v808_v35 = vpop.f32.mrf.mxu3 }
 0x1ed   :  { %v564_v36 = vadd.f32 %v1255_v18, %v563_v34  ;;  %v809_v37 = vadd.f32 %v1311_v41, %v808_v35 }
 0x1ef   :  { %v629_v38 = vmax.f32 %v564_v36, 0.0  ;;  %909 = vst.msk [vmem:[%s1555_s7 + $0x38] sm:$0xff] %vm901_vm1, %v809_v37 }
 0x1f1   :  { %970 = vmatmul.msk.f32.gmra.mxu3 %vm655_vm0, %v629_v38 }
 0x1f4   :  { %v566_v39 = vpop.f32.mrf.mxu2  ;;  %v811_v40 = vpop.f32.mrf.mxu3 }
 0x1f5   :  { %v567_v42 = vadd.f32 %v1255_v18, %v566_v39  ;;  %v812_v43 = vadd.f32 %v1311_v41, %v811_v40 }
 0x1f7   :  { %v630_v44 = vmax.f32 %v567_v42, 0.0  ;;  %910 = vst.msk [vmem:[%s1555_s7 + $0x40] sm:$0xff] %vm901_vm1, %v812_v43 }
 0x1f9   :  { %971 = vmatmul.msk.f32.gmra.mxu3 %vm655_vm0, %v630_v44 }
 0x1fc   :  { %v569_v45 = vpop.f32.mrf.mxu2  ;;  %v814_v46 = vpop.f32.mrf.mxu3 }
 0x1fd   :  { %v570_v47 = vadd.f32 %v1255_v18, %v569_v45  ;;  %v815_v48 = vadd.f32 %v1311_v41, %v814_v46 }
 0x1ff   :  { %v631_v49 = vmax.f32 %v570_v47, 0.0  ;;  %911 = vst.msk [vmem:[%s1555_s7 + $0x48] sm:$0xff] %vm901_vm1, %v815_v48 }
 0x201   :  { %972 = vmatmul.msk.f32.gmra.mxu3 %vm655_vm0, %v631_v49 }
 0x204   :  { %v572_v50 = vpop.f32.mrf.mxu2  ;;  %v817_v51 = vpop.f32.mrf.mxu3 }
 0x205   :  { %v573_v52 = vadd.f32 %v1255_v18, %v572_v50  ;;  %v818_v53 = vadd.f32 %v1311_v41, %v817_v51 }
 0x207   :  { %v632_v54 = vmax.f32 %v573_v52, 0.0  ;;  %912 = vst.msk [vmem:[%s1555_s7 + $0x50] sm:$0xff] %vm901_vm1, %v818_v53 }
 0x209   :  { %973 = vmatmul.msk.f32.gmra.mxu3 %vm655_vm0, %v632_v54 }
 0x20c   :  { %v575_v55 = vpop.f32.mrf.mxu2  ;;  %v820_v56 = vpop.f32.mrf.mxu3 }
 0x20d   :  { %v576_v57 = vadd.f32 %v1255_v18, %v575_v55  ;;  %v821_v58 = vadd.f32 %v1311_v41, %v820_v56 }
 0x20f   :  { %v633_v59 = vmax.f32 %v576_v57, 0.0  ;;  %913 = vst.msk [vmem:[%s1555_s7 + $0x58] sm:$0xff] %vm901_vm1, %v821_v58 }
 0x211   :  { %974 = vmatmul.msk.f32.gmra.mxu3 %vm655_vm0, %v633_v59 }
 0x214   :  { %v578_v60 = vpop.f32.mrf.mxu2  ;;  %v823_v61 = vpop.f32.mrf.mxu3 }
 0x215   :  { %v579_v62 = vadd.f32 %v1255_v18, %v578_v60  ;;  %v824_v63 = vadd.f32 %v1311_v41, %v823_v61 }
 0x217   :  { %v634_v0 = vmax.f32 %v579_v62, 0.0  ;;  %914 = vst.msk [vmem:[%s1555_s7 + $0x60] sm:$0xff] %vm901_vm1, %v824_v63 }
 0x219   :  { %975 = vmatmul.msk.f32.gmra.mxu3 %vm655_vm0, %v634_v0 }
 0x21c   :  { %v581_v1 = vpop.f32.mrf.mxu2  ;;  %v826_v2 = vpop.f32.mrf.mxu3 }
 0x21d   :  { %v582_v3 = vadd.f32 %v1255_v18, %v581_v1  ;;  %v827_v4 = vadd.f32 %v1311_v41, %v826_v2 }
 0x21f   :  { %v635_v5 = vmax.f32 %v582_v3, 0.0  ;;  %915 = vst.msk [vmem:[%s1555_s7 + $0x68] sm:$0xff] %vm901_vm1, %v827_v4 }
 0x221   :  { %976 = vmatmul.msk.f32.gmra.mxu3 %vm655_vm0, %v635_v5 }
 0x224   :  { %v584_v6 = vpop.f32.mrf.mxu2  ;;  %v829_v7 = vpop.f32.mrf.mxu3 }
 0x225   :  { %v585_v8 = vadd.f32 %v1255_v18, %v584_v6  ;;  %v830_v9 = vadd.f32 %v1311_v41, %v829_v7 }
 0x227   :  { %v636_v10 = vmax.f32 %v585_v8, 0.0  ;;  %916 = vst.msk [vmem:[%s1555_s7 + $0x70] sm:$0xff] %vm901_vm1, %v830_v9 }
 0x229   :  { %977 = vmatmul.msk.f32.gmra.mxu3 %vm655_vm0, %v636_v10 }
 0x22c   :  { %v587_v11 = vpop.f32.mrf.mxu2  ;;  %v832_v12 = vpop.f32.mrf.mxu3 }
 0x22d   :  { %v588_v13 = vadd.f32 %v1255_v18, %v587_v11  ;;  %v833_v14 = vadd.f32 %v1311_v41, %v832_v12 }
 0x22f   :  { %v637_v15 = vmax.f32 %v588_v13, 0.0  ;;  %917 = vst.msk [vmem:[%s1555_s7 + $0x78] sm:$0xff] %vm901_vm1, %v833_v14 }
 0x231   :  { %978 = vmatmul.msk.f32.gmra.mxu3 %vm655_vm0, %v637_v15 }
 0x234   :  { %v590_v17 = vpop.f32.mrf.mxu2  ;;  %v835_v19 = vpop.f32.mrf.mxu3 }
 0x235   :  { %v591_v20 = vadd.f32 %v1255_v18, %v590_v17  ;;  %v836_v21 = vadd.f32 %v1311_v41, %v835_v19 }
 0x237   :  { %v638_v16 = vmax.f32 %v591_v20, 0.0  ;;  %918 = vst.msk [vmem:[%s1555_s7 + $0x80] sm:$0xff] %vm901_vm1, %v836_v21 }
 0x239   :  { %979 = vmatmul.msk.f32.gmra.mxu3 %vm655_vm0, %v638_v16 }
 0x23c   :  { %v593_v22 = vpop.f32.mrf.mxu2  ;;  %v838_v23 = vpop.f32.mrf.mxu3 }
 0x23d   :  { %v594_v24 = vadd.f32 %v1255_v18, %v593_v22  ;;  %v839_v25 = vadd.f32 %v1311_v41, %v838_v23 }
 0x23f   :  { %v639_v26 = vmax.f32 %v594_v24, 0.0  ;;  %919 = vst.msk [vmem:[%s1555_s7 + $0x88] sm:$0xff] %vm901_vm1, %v839_v25 }
 0x241   :  { %980 = vmatmul.msk.f32.gmra.mxu3 %vm655_vm0, %v639_v26 }
 0x244   :  { %v596_v27 = vpop.f32.mrf.mxu2  ;;  %v841_v28 = vpop.f32.mrf.mxu3 }
 0x245   :  { %v597_v29 = vadd.f32 %v1255_v18, %v596_v27  ;;  %v842_v30 = vadd.f32 %v1311_v41, %v841_v28 }
 0x247   :  { %v640_v31 = vmax.f32 %v597_v29, 0.0  ;;  %920 = vst.msk [vmem:[%s1555_s7 + $0x90] sm:$0xff] %vm901_vm1, %v842_v30 }
 0x249   :  { %981 = vmatmul.msk.f32.gmra.mxu3 %vm655_vm0, %v640_v31 }
 0x24c   :  { %v599_v32 = vpop.f32.mrf.mxu2  ;;  %v844_v33 = vpop.f32.mrf.mxu3 }
 0x24d   :  { %v600_v34 = vadd.f32 %v1255_v18, %v599_v32  ;;  %v845_v35 = vadd.f32 %v1311_v41, %v844_v33 }
 0x24f   :  { %v641_v36 = vmax.f32 %v600_v34, 0.0  ;;  %921 = vst.msk [vmem:[%s1555_s7 + $0x98] sm:$0xff] %vm901_vm1, %v845_v35 }
 0x251   :  { %982 = vmatmul.msk.f32.gmra.mxu3 %vm655_vm0, %v641_v36 }
 0x254   :  { %v602_v37 = vpop.f32.mrf.mxu2  ;;  %v847_v38 = vpop.f32.mrf.mxu3 }
 0x255   :  { %v603_v39 = vadd.f32 %v1255_v18, %v602_v37  ;;  %v848_v40 = vadd.f32 %v1311_v41, %v847_v38 }
 0x257   :  { %v642_v42 = vmax.f32 %v603_v39, 0.0  ;;  %922 = vst.msk [vmem:[%s1555_s7 + $0xa0] sm:$0xff] %vm901_vm1, %v848_v40 }
 0x259   :  { %983 = vmatmul.msk.f32.gmra.mxu3 %vm655_vm0, %v642_v42 }
 0x25c   :  { %v850_v43 = vpop.f32.mrf.mxu3 }
 0x25d   :  { %v851_v44 = vadd.f32 %v1311_v41, %v850_v43 }
 0x25f   :  { %923 = vst.msk [vmem:[%s1555_s7 + $0xa8] sm:$0xff] %vm901_vm1, %v851_v44 }
 0x264   :  { %v853_v45 = vpop.f32.mrf.mxu3 }
 0x265   :  { %v854_v18 = vadd.f32 %v1311_v41, %v853_v45 }
 0x267   :  { %924 = vst.msk [vmem:[%s1555_s7 + $0xb0] sm:$0xff] %vm901_vm1, %v854_v18 }
 0x26c   :  { %v856_v46 = vpop.f32.mrf.mxu3 }
 0x26d   :  { %v857_v47 = vadd.f32 %v1311_v41, %v856_v46 }
 0x26f   :  { %925 = vst.msk [vmem:[%s1555_s7 + $0xb8] sm:$0xff] %vm901_vm1, %v857_v47 }
 0x274   :  { %v859_v48 = vpop.f32.mrf.mxu3 }
 0x275   :  { %v860_v49 = vadd.f32 %v1311_v41, %v859_v48 }
 0x277   :  { %926 = vst.msk [vmem:[%s1555_s7 + $0xc0] sm:$0xff] %vm901_vm1, %v860_v49 }
 0x27c   :  { %v862_v50 = vpop.f32.mrf.mxu3 }
 0x27d   :  { %v863_v51 = vadd.f32 %v1311_v41, %v862_v50 }
 0x27f   :  { %927 = vst.msk [vmem:[%s1555_s7 + $0xc8] sm:$0xff] %vm901_vm1, %v863_v51 }
 0x284   :  { %v865_v52 = vpop.f32.mrf.mxu3 }
 0x285   :  { %v866_v53 = vadd.f32 %v1311_v41, %v865_v52 }
 0x287   :  { %928 = vst.msk [vmem:[%s1555_s7 + $0xd0] sm:$0xff] %vm901_vm1, %v866_v53 }
 0x28c   :  { %v868_v54 = vpop.f32.mrf.mxu3 }
 0x28d   :  { %v869_v55 = vadd.f32 %v1311_v41, %v868_v54 }
 0x28f   :  { %929 = vst.msk [vmem:[%s1555_s7 + $0xd8] sm:$0xff] %vm901_vm1, %v869_v55 }
 0x294   :  { %v871_v56 = vpop.f32.mrf.mxu3 }
 0x295   :  { %v872_v57 = vadd.f32 %v1311_v41, %v871_v56 }
 0x297   :  { %930 = vst.msk [vmem:[%s1555_s7 + $0xe0] sm:$0xff] %vm901_vm1, %v872_v57 }
 0x29c   :  { %v874_v58 = vpop.f32.mrf.mxu3 }
 0x29d   :  { %v875_v59 = vadd.f32 %v1311_v41, %v874_v58 }
 0x29f   :  { %931 = vst.msk [vmem:[%s1555_s7 + $0xe8] sm:$0xff] %vm901_vm1, %v875_v59 }
 0x2a4   :  { %v877_v60 = vpop.f32.mrf.mxu3 }
 0x2a5   :  { %v878_v61 = vadd.f32 %v1311_v41, %v877_v60 }
 0x2a7   :  { %932 = vst.msk [vmem:[%s1555_s7 + $0xf0] sm:$0xff] %vm901_vm1, %v878_v61 }
 0x2ac   :  { %v880_v62 = vpop.f32.mrf.mxu3 }
 0x2ad   :  { %v881_v63 = vadd.f32 %v1311_v41, %v880_v62 }
 0x2af   :  { %933 = vst.msk [vmem:[%s1555_s7 + $0xf8] sm:$0xff] %vm901_vm1, %v881_v63 }
 0x2b4   :  { %v883_v0 = vpop.f32.mrf.mxu3 }
 0x2b5   :  { %v884_v1 = vadd.f32 %v1311_v41, %v883_v0 }
 0x2b7   :  { %934 = vst.msk [vmem:[%s1555_s7 + $0x100] sm:$0xff] %vm901_vm1, %v884_v1 }
 0x2bc   :  { %v886_v2 = vpop.f32.mrf.mxu3 }
 0x2bd   :  { %v887_v3 = vadd.f32 %v1311_v41, %v886_v2 }
 0x2bf   :  { %935 = vst.msk [vmem:[%s1555_s7 + $0x108] sm:$0xff] %vm901_vm1, %v887_v3 }
 0x2c4   :  { %v889_v4 = vpop.f32.mrf.mxu3 }
 0x2c5   :  { %v890_v5 = vadd.f32 %v1311_v41, %v889_v4 }
 0x2c7   :  { %936 = vst.msk [vmem:[%s1555_s7 + $0x110] sm:$0xff] %vm901_vm1, %v890_v5 }
 0x2cc   :  { %v892_v6 = vpop.f32.mrf.mxu3 }
 0x2cd   :  { %v893_v7 = vadd.f32 %v1311_v41, %v892_v6 }
 0x2cf   :  { %937 = vst.msk [vmem:[%s1555_s7 + $0x118] sm:$0xff] %vm901_vm1, %v893_v7 }
 0x2d4   :  { %v895_v8 = vpop.f32.mrf.mxu3 }
 0x2d5   :  { %v896_v9 = vadd.f32 %v1311_v41, %v895_v8 }
 0x2d7   :  { %938 = vst.msk [vmem:[%s1555_s7 + $0x120] sm:$0xff] %vm901_vm1, %v896_v9 }
 0x2dc   :  { %v898_v10 = vpop.f32.mrf.mxu3 }
 0x2dd   :  { %v899_v11 = vadd.f32 %v1311_v41, %v898_v10 }
 0x2df   :  { %940 = vst.msk [vmem:[%s1555_s7 + $0x128] sm:$0xf] %vm939_vm2, %v899_v11 }
 0x2e0   :  { %945 = vsyncpa [#allocation3], 1 }

</bundles_post_ra>
